<compile_context>
chip_gen: v6e
topology: v6e:2x2x1
jax: 0.10.0
libtpu: 0.0.40
codegen_flags: <defaults>
</compile_context>

<pallas_src>
import functools

import jax
import jax.numpy as jnp
from jax.experimental import pallas as pl
from jax.experimental.pallas import tpu as pltpu


_EPS = 1e-5  # torch.nn.LayerNorm default eps

# Row indices inside the packed [num_rows, P] f32 vector slab.
_ROW_B1, _ROW_G1, _ROW_BE1 = 0, 1, 2
_ROW_B2, _ROW_G2, _ROW_BE2 = 3, 4, 5
_ROW_B3, _ROW_G3, _ROW_BE3 = 6, 7, 8
_ROW_BA = 9
_ROW_WQ = 10
_ROW_BQ = 11
_ROW_WA0 = 12  # wa rows (n_actions of them) start here


def _layernorm(x, gamma_row, beta_row):
    # Two-pass LayerNorm over the last axis (biased variance, matches torch).
    # gamma is folded into the rsqrt scale.
    mu = jnp.mean(x, axis=-1, keepdims=True)
    xc = x - mu
    var = jnp.mean(xc * xc, axis=-1, keepdims=True)
    return xc * (gamma_row * jax.lax.rsqrt(var + _EPS)) + beta_row


def critic_kernel(state_ref, action_ref, w1_ref, w2_ref, w3_ref, vec_ref,
                  out_ref, *, fc1_dims, fc2_dims, fc3_dims, n_actions):
    f32 = jnp.float32
    bf16 = jnp.bfloat16

    def vrow(r, d):
        return vec_ref[r:r + 1, 0:d]

    # ---- state path: fc1 -> LN -> relu -> fc2 -> LN -> relu -> fc3 -> LN ----
    x = state_ref[...]  # bf16 (cast in wrapper)

    h = jnp.dot(x, w1_ref[...], preferred_element_type=f32)
    h = h + vrow(_ROW_B1, fc1_dims)
    h = jnp.maximum(
        _layernorm(h, vrow(_ROW_G1, fc1_dims), vrow(_ROW_BE1, fc1_dims)), 0.0)

    h = jnp.dot(h.astype(bf16), w2_ref[...], preferred_element_type=f32)
    h = h + vrow(_ROW_B2, fc2_dims)
    h = jnp.maximum(
        _layernorm(h, vrow(_ROW_G2, fc2_dims), vrow(_ROW_BE2, fc2_dims)), 0.0)

    h = jnp.dot(h.astype(bf16), w3_ref[...], preferred_element_type=f32)
    h = h + vrow(_ROW_B3, fc3_dims)
    # NOTE: no relu after fc3+LN (matches the torch code).
    h = _layernorm(h, vrow(_ROW_G3, fc3_dims), vrow(_ROW_BE3, fc3_dims))

    # ---- action path: relu(action @ wa + ba) as n_actions VPU rank-1 FMAs ---
    act = action_ref[...].astype(f32)              # [TB, n_actions], f32
    a = vrow(_ROW_BA, fc3_dims)                    # [1, fc3] bias row
    for k in range(n_actions):                     # n_actions is tiny & static
        a = a + act[:, k:k + 1] * vrow(_ROW_WA0 + k, fc3_dims)
    a = jnp.maximum(a, 0.0)

    # ---- fuse: relu(state_value + action_value) -> q (VPU mul + lane reduce)
    sa = jnp.maximum(h + a, 0.0)
    q = jnp.sum(sa * vrow(_ROW_WQ, fc3_dims), axis=-1, keepdims=True) \
        + vrow(_ROW_BQ, 1)
    out_ref[...] = q.astype(out_ref.dtype)


def _pack_vectors(params, fc1, fc2, fc3, n_actions, P, num_rows):
    """Pack all small per-feature parameters into one [num_rows, P] f32 slab."""
    def row(v, d):
        r = jnp.zeros((P,), jnp.float32)
        return r.at[:d].set(jnp.asarray(v, jnp.float32).reshape(-1))

    rows = [
        row(params["b1"], fc1), row(params["g1"], fc1), row(params["be1"], fc1),
        row(params["b2"], fc2), row(params["g2"], fc2), row(params["be2"], fc2),
        row(params["b3"], fc3), row(params["g3"], fc3), row(params["be3"], fc3),
        row(params["ba"], fc3),
        row(params["wq"], fc3),   # q-head weight as a [fc3]-wide row
        row(params["bq"], 1),     # scalar bq in lane 0
    ]
    wa = jnp.asarray(params["wa"], jnp.float32)     # [n_actions, fc3]
    rows += [row(wa[k], fc3) for k in range(n_actions)]
    rows += [jnp.zeros((P,), jnp.float32)] * (num_rows - len(rows))
    return jnp.stack(rows)


def critic_forward(state, action, params, *, block_b=1024):
    """params: dict with transposed weights [in, out] and [1, out] vectors."""
    B, input_dims = state.shape
    n_actions = action.shape[1]
    fc1 = params["w1"].shape[1]
    fc2 = params["w2"].shape[1]
    fc3 = params["w3"].shape[1]

    # bf16 everywhere that feeds the MXU; everything else stays f32.
    state_bf = state.astype(jnp.bfloat16)
    action_f32 = action.astype(jnp.float32)
    w1 = params["w1"].astype(jnp.bfloat16)
    w2 = params["w2"].astype(jnp.bfloat16)
    w3 = params["w3"].astype(jnp.bfloat16)

    # Packed vector slab, lane-padded to a multiple of 128.
    P = 128 * pl.cdiv(max(fc1, fc2, fc3), 128)
    num_rows = 8 * pl.cdiv(_ROW_WA0 + n_actions, 8)
    vecs = _pack_vectors(params, fc1, fc2, fc3, n_actions, P, num_rows)

    # Batch tile: whole batch if tiny, else >=2 grid steps (v7x 2-TC sharding),
    # 16-row aligned (bf16-friendly sublane tiling), capped by block_b.
    block_b = max(16, (block_b // 16) * 16)
    if B <= 16:
        TB = B
    else:
        TB = min(block_b, 16 * pl.cdiv(pl.cdiv(B, 2), 16))
    grid = (pl.cdiv(B, TB),)

    # Explicit VMEM budget (defaults: 16 MiB v5e / 32 MiB v6e+v7x scoped).
    def r128(x):
        return 128 * pl.cdiv(x, 128)
    fmax = max(r128(fc1), r128(fc2), r128(fc3))
    weight_bytes = 2 * 2 * (r128(input_dims) * r128(fc1)
                            + r128(fc1) * r128(fc2)
                            + r128(fc2) * r128(fc3))            # bf16, 2 bufs worst case
    vec_bytes = 2 * 4 * num_rows * P
    io_bytes = 2 * TB * (2 * r128(input_dims) + 4 * r128(n_actions) + 4 * 128)
    act_bytes = 8 * TB * fmax * 4                               # activation temporaries
    vmem_limit = weight_bytes + vec_bytes + io_bytes + act_bytes + (4 << 20)
    vmem_limit = int(min(max(vmem_limit, 32 << 20), 64 << 20))

    kernel = functools.partial(critic_kernel, fc1_dims=fc1, fc2_dims=fc2,
                               fc3_dims=fc3, n_actions=n_actions)
    cparams = pltpu.CompilerParams(
        dimension_semantics=("parallel",),
        vmem_limit_bytes=vmem_limit)

    def launch(resident_mode):
        def resident(shape):
            if resident_mode is None:
                return pl.BlockSpec(shape, lambda i: (0, 0))
            return pl.BlockSpec(shape, lambda i: (0, 0),
                                pipeline_mode=resident_mode)

        return pl.pallas_call(
            kernel,
            out_shape=jax.ShapeDtypeStruct((B, 1), jnp.float32),
            grid=grid,
            in_specs=[
                pl.BlockSpec((TB, input_dims), lambda i: (i, 0)),   # state tile
                pl.BlockSpec((TB, n_actions), lambda i: (i, 0)),    # action tile
                resident((input_dims, fc1)),                        # w1 (resident)
                resident((fc1, fc2)),                               # w2 (resident)
                resident((fc2, fc3)),                               # w3 (resident)
                resident((num_rows, P)),                            # packed vectors
            ],
            out_specs=pl.BlockSpec((TB, 1), lambda i: (i, 0)),
            compiler_params=cparams,
        )(state_bf, action_f32, w1, w2, w3, vecs)

    try:
        # Grid-invariant inputs: single-buffered (halves resident VMEM on v7x).
        return launch(pl.Buffered(1))
    except Exception:
        # TODO(synk): fallback for jax builds that reject pipeline_mode=Buffered(1).
        return launch(None)


def make_params(key, input_dims, fc1_dims, fc2_dims, fc3_dims, n_actions):
    """Deterministic synthetic init mirroring CriticNetwork.__init__ bounds."""
    ks = jax.random.split(key, 10)
    f1 = 1.0 / jnp.sqrt(fc1_dims)   # torch code uses weight.size()[0] == out_features
    f2 = 1.0 / jnp.sqrt(fc2_dims)
    f3 = 1.0 / jnp.sqrt(fc3_dims)
    fa = 1.0 / jnp.sqrt(n_actions)  # synthetic approx of default init bound
    f4 = 0.003

    def u(k, shape, bound):
        return jax.random.uniform(k, shape, jnp.float32, -bound, bound)

    return {
        # weights are stored [in, out] (transposed vs torch's [out, in])
        "w1": u(ks[0], (input_dims, fc1_dims), f1),
        "b1": u(ks[1], (1, fc1_dims), f1),
        "g1": jnp.ones((1, fc1_dims), jnp.float32),
        "be1": jnp.zeros((1, fc1_dims), jnp.float32),
        "w2": u(ks[2], (fc1_dims, fc2_dims), f2),
        "b2": u(ks[3], (1, fc2_dims), f2),
        "g2": jnp.ones((1, fc2_dims), jnp.float32),
        "be2": jnp.zeros((1, fc2_dims), jnp.float32),
        "w3": u(ks[4], (fc2_dims, fc3_dims), f3),
        "b3": u(ks[5], (1, fc3_dims), f3),
        "g3": jnp.ones((1, fc3_dims), jnp.float32),
        "be3": jnp.zeros((1, fc3_dims), jnp.float32),
        "wa": u(ks[6], (n_actions, fc3_dims), fa),
        "ba": u(ks[7], (1, fc3_dims), fa),
        "wq": u(ks[8], (fc3_dims, 1), f4),
        "bq": u(ks[9], (1, 1), f4),
    }


def critic_forward_ref(state, action, p, *, matmul_dtype=jnp.float32):
    """Pure-JAX reference. matmul_dtype=bfloat16 mirrors the kernel's MXU casts."""
    def ln(x, g, b):
        mu = jnp.mean(x, -1, keepdims=True)
        var = jnp.mean((x - mu) ** 2, -1, keepdims=True)
        return (x - mu) / jnp.sqrt(var + _EPS) * g + b

    def mm(x, w):
        return jnp.dot(x.astype(matmul_dtype), w.astype(matmul_dtype),
                       preferred_element_type=jnp.float32)

    h = jax.nn.relu(ln(mm(state, p["w1"]) + p["b1"], p["g1"], p["be1"]))
    h = jax.nn.relu(ln(mm(h, p["w2"]) + p["b2"], p["g2"], p["be2"]))
    h = ln(mm(h, p["w3"]) + p["b3"], p["g3"], p["be3"])
    a = jax.nn.relu(action @ p["wa"] + p["ba"])
    sa = jax.nn.relu(h + a)
    return sa @ p["wq"] + p["bq"]


if __name__ == "__main__":
    B = 32
    input_dims = 16
    fc1_dims, fc2_dims, fc3_dims = 32, 32, 32
    n_actions = 4

    key = jax.random.PRNGKey(0)
    k_state, k_action, k_params = jax.random.split(key, 3)

    state = jax.random.normal(k_state, (B, input_dims), jnp.float32)
    action = jax.random.normal(k_action, (B, n_actions), jnp.float32)
    params = make_params(k_params, input_dims, fc1_dims, fc2_dims, fc3_dims,
                         n_actions)

    out = jax.block_until_ready(critic_forward(state, action, params))
    assert out.shape == (B, 1)

    # Tight check vs. a reference that applies the same bf16 casts at the dots,
    # loose check vs. the pure-f32 reference (bf16 matmul rounding).
    ref_bf16 = critic_forward_ref(state, action, params,
                                  matmul_dtype=jnp.bfloat16)
    ref_f32 = critic_forward_ref(state, action, params,
                                 matmul_dtype=jnp.float32)
    assert jnp.allclose(out, ref_bf16, atol=2e-3, rtol=2e-3), (out, ref_bf16)
    assert jnp.allclose(out, ref_f32, atol=2e-2, rtol=2e-2), (out, ref_f32)

    print("KERNEL_OK")
</pallas_src>

<mosaic_0001>
module attributes {stable_mosaic.version = 11 : i64} {
  func.func @critic_kernel(%arg0: i32, %arg1: memref<16x16xbf16, #tpu.memory_space<vmem>>, %arg2: memref<16x4xf32, #tpu.memory_space<vmem>>, %arg3: memref<16x32xbf16, #tpu.memory_space<vmem>>, %arg4: memref<32x32xbf16, #tpu.memory_space<vmem>>, %arg5: memref<32x32xbf16, #tpu.memory_space<vmem>>, %arg6: memref<16x128xf32, #tpu.memory_space<vmem>>, %arg7: memref<16x1xf32, #tpu.memory_space<vmem>>) attributes {dimension_semantics = [#tpu.dimension_semantics<parallel>], iteration_bounds = array<i64: 2>, scalar_prefetch = 0 : i64, scratch_operands = 0 : i64, tpu.core_type = #tpu.core_type<tc>, window_params = [{transform_indices = @transform_0, window_bounds = array<i64: 16, 16>}, {transform_indices = @transform_1, window_bounds = array<i64: 16, 4>}, {pipeline_mode = #tpu.pipeline_mode<synchronous>, transform_indices = @transform_2, window_bounds = array<i64: 16, 32>}, {pipeline_mode = #tpu.pipeline_mode<synchronous>, transform_indices = @transform_3, window_bounds = array<i64: 32, 32>}, {pipeline_mode = #tpu.pipeline_mode<synchronous>, transform_indices = @transform_4, window_bounds = array<i64: 32, 32>}, {pipeline_mode = #tpu.pipeline_mode<synchronous>, transform_indices = @transform_5, window_bounds = array<i64: 16, 128>}, {transform_indices = @transform_6, window_bounds = array<i64: 16, 1>}]} {
    %c0 = arith.constant 0 : index
    %c0_0 = arith.constant 0 : index
    %0 = vector.load %arg1[%c0, %c0_0] : memref<16x16xbf16, #tpu.memory_space<vmem>>, vector<16x16xbf16>
    %c0_1 = arith.constant 0 : index
    %c0_2 = arith.constant 0 : index
    %1 = vector.load %arg3[%c0_1, %c0_2] : memref<16x32xbf16, #tpu.memory_space<vmem>>, vector<16x32xbf16>
    %cst = arith.constant dense<0.000000e+00> : vector<16x32xf32>
    %2 = tpu.matmul %0, %1, %cst {dimension_numbers = #tpu.dot_dimension_numbers<[1], [0], [0], [1], [0, 0, 1, 1], [], []>} : vector<16x16xbf16>, vector<16x32xbf16>, vector<16x32xf32> -> vector<16x32xf32>
    %c0_3 = arith.constant 0 : index
    %c0_4 = arith.constant 0 : index
    %3 = vector.load %arg6[%c0_3, %c0_4] : memref<16x128xf32, #tpu.memory_space<vmem>>, vector<1x32xf32>
    %4 = vector.broadcast %3 : vector<1x32xf32> to vector<16x32xf32>
    %5 = arith.addf %2, %4 : vector<16x32xf32>
    %c1 = arith.constant 1 : index
    %c0_5 = arith.constant 0 : index
    %6 = vector.load %arg6[%c1, %c0_5] : memref<16x128xf32, #tpu.memory_space<vmem>>, vector<1x32xf32>
    %c2 = arith.constant 2 : index
    %c0_6 = arith.constant 0 : index
    %7 = vector.load %arg6[%c2, %c0_6] : memref<16x128xf32, #tpu.memory_space<vmem>>, vector<1x32xf32>
    %cst_7 = arith.constant dense<0.000000e+00> : vector<16xf32>
    %8 = vector.multi_reduction <add>, %5, %cst_7 [1] : vector<16x32xf32> to vector<16xf32>
    %9 = vector.shape_cast %8 : vector<16xf32> to vector<16x1xf32>
    %cst_8 = arith.constant 3.200000e+01 : f32
    %10 = vector.broadcast %cst_8 : f32 to vector<16x1xf32>
    %11 = arith.divf %9, %10 : vector<16x1xf32>
    %12 = vector.broadcast %11 : vector<16x1xf32> to vector<16x32xf32>
    %13 = arith.subf %5, %12 : vector<16x32xf32>
    %14 = arith.mulf %13, %13 : vector<16x32xf32>
    %cst_9 = arith.constant dense<0.000000e+00> : vector<16xf32>
    %15 = vector.multi_reduction <add>, %14, %cst_9 [1] : vector<16x32xf32> to vector<16xf32>
    %16 = vector.shape_cast %15 : vector<16xf32> to vector<16x1xf32>
    %cst_10 = arith.constant 3.200000e+01 : f32
    %17 = vector.broadcast %cst_10 : f32 to vector<16x1xf32>
    %18 = arith.divf %16, %17 : vector<16x1xf32>
    %cst_11 = arith.constant 9.99999974E-6 : f32
    %19 = vector.broadcast %cst_11 : f32 to vector<16x1xf32>
    %20 = arith.addf %18, %19 : vector<16x1xf32>
    %21 = math.rsqrt %20 : vector<16x1xf32>
    %22 = vector.broadcast %6 : vector<1x32xf32> to vector<16x32xf32>
    %23 = vector.broadcast %21 : vector<16x1xf32> to vector<16x32xf32>
    %24 = arith.mulf %22, %23 : vector<16x32xf32>
    %25 = arith.mulf %13, %24 : vector<16x32xf32>
    %26 = vector.broadcast %7 : vector<1x32xf32> to vector<16x32xf32>
    %27 = arith.addf %25, %26 : vector<16x32xf32>
    %cst_12 = arith.constant 0.000000e+00 : f32
    %28 = vector.broadcast %cst_12 : f32 to vector<16x32xf32>
    %29 = arith.maximumf %27, %28 : vector<16x32xf32>
    %30 = arith.truncf %29 : vector<16x32xf32> to vector<16x32xbf16>
    %c0_13 = arith.constant 0 : index
    %c0_14 = arith.constant 0 : index
    %31 = vector.load %arg4[%c0_13, %c0_14] : memref<32x32xbf16, #tpu.memory_space<vmem>>, vector<32x32xbf16>
    %cst_15 = arith.constant dense<0.000000e+00> : vector<16x32xf32>
    %32 = tpu.matmul %30, %31, %cst_15 {dimension_numbers = #tpu.dot_dimension_numbers<[1], [0], [0], [1], [0, 0, 1, 1], [], []>} : vector<16x32xbf16>, vector<32x32xbf16>, vector<16x32xf32> -> vector<16x32xf32>
    %c3 = arith.constant 3 : index
    %c0_16 = arith.constant 0 : index
    %33 = vector.load %arg6[%c3, %c0_16] : memref<16x128xf32, #tpu.memory_space<vmem>>, vector<1x32xf32>
    %34 = vector.broadcast %33 : vector<1x32xf32> to vector<16x32xf32>
    %35 = arith.addf %32, %34 : vector<16x32xf32>
    %c4 = arith.constant 4 : index
    %c0_17 = arith.constant 0 : index
    %36 = vector.load %arg6[%c4, %c0_17] : memref<16x128xf32, #tpu.memory_space<vmem>>, vector<1x32xf32>
    %c5 = arith.constant 5 : index
    %c0_18 = arith.constant 0 : index
    %37 = vector.load %arg6[%c5, %c0_18] : memref<16x128xf32, #tpu.memory_space<vmem>>, vector<1x32xf32>
    %cst_19 = arith.constant dense<0.000000e+00> : vector<16xf32>
    %38 = vector.multi_reduction <add>, %35, %cst_19 [1] : vector<16x32xf32> to vector<16xf32>
    %39 = vector.shape_cast %38 : vector<16xf32> to vector<16x1xf32>
    %cst_20 = arith.constant 3.200000e+01 : f32
    %40 = vector.broadcast %cst_20 : f32 to vector<16x1xf32>
    %41 = arith.divf %39, %40 : vector<16x1xf32>
    %42 = vector.broadcast %41 : vector<16x1xf32> to vector<16x32xf32>
    %43 = arith.subf %35, %42 : vector<16x32xf32>
    %44 = arith.mulf %43, %43 : vector<16x32xf32>
    %cst_21 = arith.constant dense<0.000000e+00> : vector<16xf32>
    %45 = vector.multi_reduction <add>, %44, %cst_21 [1] : vector<16x32xf32> to vector<16xf32>
    %46 = vector.shape_cast %45 : vector<16xf32> to vector<16x1xf32>
    %cst_22 = arith.constant 3.200000e+01 : f32
    %47 = vector.broadcast %cst_22 : f32 to vector<16x1xf32>
    %48 = arith.divf %46, %47 : vector<16x1xf32>
    %cst_23 = arith.constant 9.99999974E-6 : f32
    %49 = vector.broadcast %cst_23 : f32 to vector<16x1xf32>
    %50 = arith.addf %48, %49 : vector<16x1xf32>
    %51 = math.rsqrt %50 : vector<16x1xf32>
    %52 = vector.broadcast %36 : vector<1x32xf32> to vector<16x32xf32>
    %53 = vector.broadcast %51 : vector<16x1xf32> to vector<16x32xf32>
    %54 = arith.mulf %52, %53 : vector<16x32xf32>
    %55 = arith.mulf %43, %54 : vector<16x32xf32>
    %56 = vector.broadcast %37 : vector<1x32xf32> to vector<16x32xf32>
    %57 = arith.addf %55, %56 : vector<16x32xf32>
    %cst_24 = arith.constant 0.000000e+00 : f32
    %58 = vector.broadcast %cst_24 : f32 to vector<16x32xf32>
    %59 = arith.maximumf %57, %58 : vector<16x32xf32>
    %60 = arith.truncf %59 : vector<16x32xf32> to vector<16x32xbf16>
    %c0_25 = arith.constant 0 : index
    %c0_26 = arith.constant 0 : index
    %61 = vector.load %arg5[%c0_25, %c0_26] : memref<32x32xbf16, #tpu.memory_space<vmem>>, vector<32x32xbf16>
    %cst_27 = arith.constant dense<0.000000e+00> : vector<16x32xf32>
    %62 = tpu.matmul %60, %61, %cst_27 {dimension_numbers = #tpu.dot_dimension_numbers<[1], [0], [0], [1], [0, 0, 1, 1], [], []>} : vector<16x32xbf16>, vector<32x32xbf16>, vector<16x32xf32> -> vector<16x32xf32>
    %c6 = arith.constant 6 : index
    %c0_28 = arith.constant 0 : index
    %63 = vector.load %arg6[%c6, %c0_28] : memref<16x128xf32, #tpu.memory_space<vmem>>, vector<1x32xf32>
    %64 = vector.broadcast %63 : vector<1x32xf32> to vector<16x32xf32>
    %65 = arith.addf %62, %64 : vector<16x32xf32>
    %c7 = arith.constant 7 : index
    %c0_29 = arith.constant 0 : index
    %66 = vector.load %arg6[%c7, %c0_29] : memref<16x128xf32, #tpu.memory_space<vmem>>, vector<1x32xf32>
    %c8 = arith.constant 8 : index
    %c0_30 = arith.constant 0 : index
    %67 = vector.load %arg6[%c8, %c0_30] : memref<16x128xf32, #tpu.memory_space<vmem>>, vector<1x32xf32>
    %cst_31 = arith.constant dense<0.000000e+00> : vector<16xf32>
    %68 = vector.multi_reduction <add>, %65, %cst_31 [1] : vector<16x32xf32> to vector<16xf32>
    %69 = vector.shape_cast %68 : vector<16xf32> to vector<16x1xf32>
    %cst_32 = arith.constant 3.200000e+01 : f32
    %70 = vector.broadcast %cst_32 : f32 to vector<16x1xf32>
    %71 = arith.divf %69, %70 : vector<16x1xf32>
    %72 = vector.broadcast %71 : vector<16x1xf32> to vector<16x32xf32>
    %73 = arith.subf %65, %72 : vector<16x32xf32>
    %74 = arith.mulf %73, %73 : vector<16x32xf32>
    %cst_33 = arith.constant dense<0.000000e+00> : vector<16xf32>
    %75 = vector.multi_reduction <add>, %74, %cst_33 [1] : vector<16x32xf32> to vector<16xf32>
    %76 = vector.shape_cast %75 : vector<16xf32> to vector<16x1xf32>
    %cst_34 = arith.constant 3.200000e+01 : f32
    %77 = vector.broadcast %cst_34 : f32 to vector<16x1xf32>
    %78 = arith.divf %76, %77 : vector<16x1xf32>
    %cst_35 = arith.constant 9.99999974E-6 : f32
    %79 = vector.broadcast %cst_35 : f32 to vector<16x1xf32>
    %80 = arith.addf %78, %79 : vector<16x1xf32>
    %81 = math.rsqrt %80 : vector<16x1xf32>
    %82 = vector.broadcast %66 : vector<1x32xf32> to vector<16x32xf32>
    %83 = vector.broadcast %81 : vector<16x1xf32> to vector<16x32xf32>
    %84 = arith.mulf %82, %83 : vector<16x32xf32>
    %85 = arith.mulf %73, %84 : vector<16x32xf32>
    %86 = vector.broadcast %67 : vector<1x32xf32> to vector<16x32xf32>
    %87 = arith.addf %85, %86 : vector<16x32xf32>
    %c0_36 = arith.constant 0 : index
    %c0_37 = arith.constant 0 : index
    %88 = vector.load %arg2[%c0_36, %c0_37] : memref<16x4xf32, #tpu.memory_space<vmem>>, vector<16x4xf32>
    %c9 = arith.constant 9 : index
    %c0_38 = arith.constant 0 : index
    %89 = vector.load %arg6[%c9, %c0_38] : memref<16x128xf32, #tpu.memory_space<vmem>>, vector<1x32xf32>
    %90 = vector.extract_strided_slice %88 {offsets = [0, 0], sizes = [16, 1], strides = [1, 1]} : vector<16x4xf32> to vector<16x1xf32>
    %c12 = arith.constant 12 : index
    %c0_39 = arith.constant 0 : index
    %91 = vector.load %arg6[%c12, %c0_39] : memref<16x128xf32, #tpu.memory_space<vmem>>, vector<1x32xf32>
    %92 = vector.broadcast %90 : vector<16x1xf32> to vector<16x32xf32>
    %93 = vector.broadcast %91 : vector<1x32xf32> to vector<16x32xf32>
    %94 = arith.mulf %92, %93 : vector<16x32xf32>
    %95 = vector.broadcast %89 : vector<1x32xf32> to vector<16x32xf32>
    %96 = arith.addf %95, %94 : vector<16x32xf32>
    %97 = vector.extract_strided_slice %88 {offsets = [0, 1], sizes = [16, 1], strides = [1, 1]} : vector<16x4xf32> to vector<16x1xf32>
    %c13 = arith.constant 13 : index
    %c0_40 = arith.constant 0 : index
    %98 = vector.load %arg6[%c13, %c0_40] : memref<16x128xf32, #tpu.memory_space<vmem>>, vector<1x32xf32>
    %99 = vector.broadcast %97 : vector<16x1xf32> to vector<16x32xf32>
    %100 = vector.broadcast %98 : vector<1x32xf32> to vector<16x32xf32>
    %101 = arith.mulf %99, %100 : vector<16x32xf32>
    %102 = arith.addf %96, %101 : vector<16x32xf32>
    %103 = vector.extract_strided_slice %88 {offsets = [0, 2], sizes = [16, 1], strides = [1, 1]} : vector<16x4xf32> to vector<16x1xf32>
    %c14 = arith.constant 14 : index
    %c0_41 = arith.constant 0 : index
    %104 = vector.load %arg6[%c14, %c0_41] : memref<16x128xf32, #tpu.memory_space<vmem>>, vector<1x32xf32>
    %105 = vector.broadcast %103 : vector<16x1xf32> to vector<16x32xf32>
    %106 = vector.broadcast %104 : vector<1x32xf32> to vector<16x32xf32>
    %107 = arith.mulf %105, %106 : vector<16x32xf32>
    %108 = arith.addf %102, %107 : vector<16x32xf32>
    %109 = vector.extract_strided_slice %88 {offsets = [0, 3], sizes = [16, 1], strides = [1, 1]} : vector<16x4xf32> to vector<16x1xf32>
    %c15 = arith.constant 15 : index
    %c0_42 = arith.constant 0 : index
    %110 = vector.load %arg6[%c15, %c0_42] : memref<16x128xf32, #tpu.memory_space<vmem>>, vector<1x32xf32>
    %111 = vector.broadcast %109 : vector<16x1xf32> to vector<16x32xf32>
    %112 = vector.broadcast %110 : vector<1x32xf32> to vector<16x32xf32>
    %113 = arith.mulf %111, %112 : vector<16x32xf32>
    %114 = arith.addf %108, %113 : vector<16x32xf32>
    %cst_43 = arith.constant 0.000000e+00 : f32
    %115 = vector.broadcast %cst_43 : f32 to vector<16x32xf32>
    %116 = arith.maximumf %114, %115 : vector<16x32xf32>
    %117 = arith.addf %87, %116 : vector<16x32xf32>
    %cst_44 = arith.constant 0.000000e+00 : f32
    %118 = vector.broadcast %cst_44 : f32 to vector<16x32xf32>
    %119 = arith.maximumf %117, %118 : vector<16x32xf32>
    %c10 = arith.constant 10 : index
    %c0_45 = arith.constant 0 : index
    %120 = vector.load %arg6[%c10, %c0_45] : memref<16x128xf32, #tpu.memory_space<vmem>>, vector<1x32xf32>
    %121 = vector.broadcast %120 : vector<1x32xf32> to vector<16x32xf32>
    %122 = arith.mulf %119, %121 : vector<16x32xf32>
    %cst_46 = arith.constant dense<0.000000e+00> : vector<16xf32>
    %123 = vector.multi_reduction <add>, %122, %cst_46 [1] : vector<16x32xf32> to vector<16xf32>
    %124 = vector.shape_cast %123 : vector<16xf32> to vector<16x1xf32>
    %c11 = arith.constant 11 : index
    %c0_47 = arith.constant 0 : index
    %125 = vector.load %arg6[%c11, %c0_47] : memref<16x128xf32, #tpu.memory_space<vmem>>, vector<1x1xf32>
    %126 = vector.broadcast %125 : vector<1x1xf32> to vector<16x1xf32>
    %127 = arith.addf %124, %126 : vector<16x1xf32>
    %c0_48 = arith.constant 0 : index
    %c0_49 = arith.constant 0 : index
    %128 = vector.load %arg7[%c0_48, %c0_49] : memref<16x1xf32, #tpu.memory_space<vmem>>, vector<16x1xf32>
    tpu.vector_store %arg7[%c0_48, %c0_49], %127 {strides = array<i32>} : memref<16x1xf32, #tpu.memory_space<vmem>>, vector<16x1xf32>,
    return
  }
  func.func @transform_0(%arg0: i32) -> (i32, i32) {
    %c0_i32 = arith.constant 0 : i32
    %c0_i32_0 = arith.constant 0 : i32
    return %arg0, %c0_i32 : i32, i32
  }
  func.func @transform_1(%arg0: i32) -> (i32, i32) {
    %c0_i32 = arith.constant 0 : i32
    %c0_i32_0 = arith.constant 0 : i32
    return %arg0, %c0_i32 : i32, i32
  }
  func.func @transform_2(%arg0: i32) -> (i32, i32) {
    %c0_i32 = arith.constant 0 : i32
    %c0_i32_0 = arith.constant 0 : i32
    %c0_i32_1 = arith.constant 0 : i32
    return %c0_i32, %c0_i32_0 : i32, i32
  }
  func.func @transform_3(%arg0: i32) -> (i32, i32) {
    %c0_i32 = arith.constant 0 : i32
    %c0_i32_0 = arith.constant 0 : i32
    %c0_i32_1 = arith.constant 0 : i32
    return %c0_i32, %c0_i32_0 : i32, i32
  }
  func.func @transform_4(%arg0: i32) -> (i32, i32) {
    %c0_i32 = arith.constant 0 : i32
    %c0_i32_0 = arith.constant 0 : i32
    %c0_i32_1 = arith.constant 0 : i32
    return %c0_i32, %c0_i32_0 : i32, i32
  }
  func.func @transform_5(%arg0: i32) -> (i32, i32) {
    %c0_i32 = arith.constant 0 : i32
    %c0_i32_0 = arith.constant 0 : i32
    %c0_i32_1 = arith.constant 0 : i32
    return %c0_i32, %c0_i32_0 : i32, i32
  }
  func.func @transform_6(%arg0: i32) -> (i32, i32) {
    %c0_i32 = arith.constant 0 : i32
    %c0_i32_0 = arith.constant 0 : i32
    return %arg0, %c0_i32 : i32, i32
  }
}

module attributes {stable_mosaic.version = 11 : i64} {
  func.func @critic_kernel(%arg0: i32, %arg1: memref<16x16xbf16, #tpu.memory_space<vmem>>, %arg2: memref<16x4xf32, #tpu.memory_space<vmem>>, %arg3: memref<16x32xbf16, #tpu.memory_space<vmem>>, %arg4: memref<32x32xbf16, #tpu.memory_space<vmem>>, %arg5: memref<32x32xbf16, #tpu.memory_space<vmem>>, %arg6: memref<16x128xf32, #tpu.memory_space<vmem>>, %arg7: memref<16x1xf32, #tpu.memory_space<vmem>>) attributes {dimension_semantics = [#tpu.dimension_semantics<parallel>], iteration_bounds = array<i64: 2>, scalar_prefetch = 0 : i64, scratch_operands = 0 : i64, tpu.core_type = #tpu.core_type<tc>, window_params = [{transform_indices = @transform_0, window_bounds = array<i64: 16, 16>}, {transform_indices = @transform_1, window_bounds = array<i64: 16, 4>}, {pipeline_mode = #tpu.pipeline_mode<synchronous>, transform_indices = @transform_2, window_bounds = array<i64: 16, 32>}, {pipeline_mode = #tpu.pipeline_mode<synchronous>, transform_indices = @transform_3, window_bounds = array<i64: 32, 32>}, {pipeline_mode = #tpu.pipeline_mode<synchronous>, transform_indices = @transform_4, window_bounds = array<i64: 32, 32>}, {pipeline_mode = #tpu.pipeline_mode<synchronous>, transform_indices = @transform_5, window_bounds = array<i64: 16, 128>}, {transform_indices = @transform_6, window_bounds = array<i64: 16, 1>}]} {
    %c0 = arith.constant 0 : index
    %c0_0 = arith.constant 0 : index
    %0 = vector.load %arg1[%c0, %c0_0] : memref<16x16xbf16, #tpu.memory_space<vmem>>, vector<16x16xbf16>
    %c0_1 = arith.constant 0 : index
    %c0_2 = arith.constant 0 : index
    %1 = vector.load %arg3[%c0_1, %c0_2] : memref<16x32xbf16, #tpu.memory_space<vmem>>, vector<16x32xbf16>
    %cst = arith.constant dense<0.000000e+00> : vector<16x32xf32>
    %2 = tpu.matmul %0, %1, %cst {dimension_numbers = #tpu.dot_dimension_numbers<[1], [0], [0], [1], [0, 0, 1, 1], [], []>} : vector<16x16xbf16>, vector<16x32xbf16>, vector<16x32xf32> -> vector<16x32xf32>
    %c0_3 = arith.constant 0 : index
    %c0_4 = arith.constant 0 : index
    %3 = vector.load %arg6[%c0_3, %c0_4] : memref<16x128xf32, #tpu.memory_space<vmem>>, vector<1x32xf32>
    %4 = vector.broadcast %3 : vector<1x32xf32> to vector<16x32xf32>
    %5 = arith.addf %2, %4 : vector<16x32xf32>
    %c1 = arith.constant 1 : index
    %c0_5 = arith.constant 0 : index
    %6 = vector.load %arg6[%c1, %c0_5] : memref<16x128xf32, #tpu.memory_space<vmem>>, vector<1x32xf32>
    %c2 = arith.constant 2 : index
    %c0_6 = arith.constant 0 : index
    %7 = vector.load %arg6[%c2, %c0_6] : memref<16x128xf32, #tpu.memory_space<vmem>>, vector<1x32xf32>
    %cst_7 = arith.constant dense<0.000000e+00> : vector<16xf32>
    %8 = vector.multi_reduction <add>, %5, %cst_7 [1] : vector<16x32xf32> to vector<16xf32>
    %9 = vector.shape_cast %8 : vector<16xf32> to vector<16x1xf32>
    %cst_8 = arith.constant 3.200000e+01 : f32
    %10 = vector.broadcast %cst_8 : f32 to vector<16x1xf32>
    %11 = arith.divf %9, %10 : vector<16x1xf32>
    %12 = vector.broadcast %11 : vector<16x1xf32> to vector<16x32xf32>
    %13 = arith.subf %5, %12 : vector<16x32xf32>
    %14 = arith.mulf %13, %13 : vector<16x32xf32>
    %cst_9 = arith.constant dense<0.000000e+00> : vector<16xf32>
    %15 = vector.multi_reduction <add>, %14, %cst_9 [1] : vector<16x32xf32> to vector<16xf32>
    %16 = vector.shape_cast %15 : vector<16xf32> to vector<16x1xf32>
    %cst_10 = arith.constant 3.200000e+01 : f32
    %17 = vector.broadcast %cst_10 : f32 to vector<16x1xf32>
    %18 = arith.divf %16, %17 : vector<16x1xf32>
    %cst_11 = arith.constant 9.99999974E-6 : f32
    %19 = vector.broadcast %cst_11 : f32 to vector<16x1xf32>
    %20 = arith.addf %18, %19 : vector<16x1xf32>
    %21 = math.rsqrt %20 : vector<16x1xf32>
    %22 = vector.broadcast %6 : vector<1x32xf32> to vector<16x32xf32>
    %23 = vector.broadcast %21 : vector<16x1xf32> to vector<16x32xf32>
    %24 = arith.mulf %22, %23 : vector<16x32xf32>
    %25 = arith.mulf %13, %24 : vector<16x32xf32>
    %26 = vector.broadcast %7 : vector<1x32xf32> to vector<16x32xf32>
    %27 = arith.addf %25, %26 : vector<16x32xf32>
    %cst_12 = arith.constant 0.000000e+00 : f32
    %28 = vector.broadcast %cst_12 : f32 to vector<16x32xf32>
    %29 = arith.maximumf %27, %28 : vector<16x32xf32>
    %30 = arith.truncf %29 : vector<16x32xf32> to vector<16x32xbf16>
    %c0_13 = arith.constant 0 : index
    %c0_14 = arith.constant 0 : index
    %31 = vector.load %arg4[%c0_13, %c0_14] : memref<32x32xbf16, #tpu.memory_space<vmem>>, vector<32x32xbf16>
    %cst_15 = arith.constant dense<0.000000e+00> : vector<16x32xf32>
    %32 = tpu.matmul %30, %31, %cst_15 {dimension_numbers = #tpu.dot_dimension_numbers<[1], [0], [0], [1], [0, 0, 1, 1], [], []>} : vector<16x32xbf16>, vector<32x32xbf16>, vector<16x32xf32> -> vector<16x32xf32>
    %c3 = arith.constant 3 : index
    %c0_16 = arith.constant 0 : index
    %33 = vector.load %arg6[%c3, %c0_16] : memref<16x128xf32, #tpu.memory_space<vmem>>, vector<1x32xf32>
    %34 = vector.broadcast %33 : vector<1x32xf32> to vector<16x32xf32>
    %35 = arith.addf %32, %34 : vector<16x32xf32>
    %c4 = arith.constant 4 : index
    %c0_17 = arith.constant 0 : index
    %36 = vector.load %arg6[%c4, %c0_17] : memref<16x128xf32, #tpu.memory_space<vmem>>, vector<1x32xf32>
    %c5 = arith.constant 5 : index
    %c0_18 = arith.constant 0 : index
    %37 = vector.load %arg6[%c5, %c0_18] : memref<16x128xf32, #tpu.memory_space<vmem>>, vector<1x32xf32>
    %cst_19 = arith.constant dense<0.000000e+00> : vector<16xf32>
    %38 = vector.multi_reduction <add>, %35, %cst_19 [1] : vector<16x32xf32> to vector<16xf32>
    %39 = vector.shape_cast %38 : vector<16xf32> to vector<16x1xf32>
    %cst_20 = arith.constant 3.200000e+01 : f32
    %40 = vector.broadcast %cst_20 : f32 to vector<16x1xf32>
    %41 = arith.divf %39, %40 : vector<16x1xf32>
    %42 = vector.broadcast %41 : vector<16x1xf32> to vector<16x32xf32>
    %43 = arith.subf %35, %42 : vector<16x32xf32>
    %44 = arith.mulf %43, %43 : vector<16x32xf32>
    %cst_21 = arith.constant dense<0.000000e+00> : vector<16xf32>
    %45 = vector.multi_reduction <add>, %44, %cst_21 [1] : vector<16x32xf32> to vector<16xf32>
    %46 = vector.shape_cast %45 : vector<16xf32> to vector<16x1xf32>
    %cst_22 = arith.constant 3.200000e+01 : f32
    %47 = vector.broadcast %cst_22 : f32 to vector<16x1xf32>
    %48 = arith.divf %46, %47 : vector<16x1xf32>
    %cst_23 = arith.constant 9.99999974E-6 : f32
    %49 = vector.broadcast %cst_23 : f32 to vector<16x1xf32>
    %50 = arith.addf %48, %49 : vector<16x1xf32>
    %51 = math.rsqrt %50 : vector<16x1xf32>
    %52 = vector.broadcast %36 : vector<1x32xf32> to vector<16x32xf32>
    %53 = vector.broadcast %51 : vector<16x1xf32> to vector<16x32xf32>
    %54 = arith.mulf %52, %53 : vector<16x32xf32>
    %55 = arith.mulf %43, %54 : vector<16x32xf32>
    %56 = vector.broadcast %37 : vector<1x32xf32> to vector<16x32xf32>
    %57 = arith.addf %55, %56 : vector<16x32xf32>
    %cst_24 = arith.constant 0.000000e+00 : f32
    %58 = vector.broadcast %cst_24 : f32 to vector<16x32xf32>
    %59 = arith.maximumf %57, %58 : vector<16x32xf32>
    %60 = arith.truncf %59 : vector<16x32xf32> to vector<16x32xbf16>
    %c0_25 = arith.constant 0 : index
    %c0_26 = arith.constant 0 : index
    %61 = vector.load %arg5[%c0_25, %c0_26] : memref<32x32xbf16, #tpu.memory_space<vmem>>, vector<32x32xbf16>
    %cst_27 = arith.constant dense<0.000000e+00> : vector<16x32xf32>
    %62 = tpu.matmul %60, %61, %cst_27 {dimension_numbers = #tpu.dot_dimension_numbers<[1], [0], [0], [1], [0, 0, 1, 1], [], []>} : vector<16x32xbf16>, vector<32x32xbf16>, vector<16x32xf32> -> vector<16x32xf32>
    %c6 = arith.constant 6 : index
    %c0_28 = arith.constant 0 : index
    %63 = vector.load %arg6[%c6, %c0_28] : memref<16x128xf32, #tpu.memory_space<vmem>>, vector<1x32xf32>
    %64 = vector.broadcast %63 : vector<1x32xf32> to vector<16x32xf32>
    %65 = arith.addf %62, %64 : vector<16x32xf32>
    %c7 = arith.constant 7 : index
    %c0_29 = arith.constant 0 : index
    %66 = vector.load %arg6[%c7, %c0_29] : memref<16x128xf32, #tpu.memory_space<vmem>>, vector<1x32xf32>
    %c8 = arith.constant 8 : index
    %c0_30 = arith.constant 0 : index
    %67 = vector.load %arg6[%c8, %c0_30] : memref<16x128xf32, #tpu.memory_space<vmem>>, vector<1x32xf32>
    %cst_31 = arith.constant dense<0.000000e+00> : vector<16xf32>
    %68 = vector.multi_reduction <add>, %65, %cst_31 [1] : vector<16x32xf32> to vector<16xf32>
    %69 = vector.shape_cast %68 : vector<16xf32> to vector<16x1xf32>
    %cst_32 = arith.constant 3.200000e+01 : f32
    %70 = vector.broadcast %cst_32 : f32 to vector<16x1xf32>
    %71 = arith.divf %69, %70 : vector<16x1xf32>
    %72 = vector.broadcast %71 : vector<16x1xf32> to vector<16x32xf32>
    %73 = arith.subf %65, %72 : vector<16x32xf32>
    %74 = arith.mulf %73, %73 : vector<16x32xf32>
    %cst_33 = arith.constant dense<0.000000e+00> : vector<16xf32>
    %75 = vector.multi_reduction <add>, %74, %cst_33 [1] : vector<16x32xf32> to vector<16xf32>
    %76 = vector.shape_cast %75 : vector<16xf32> to vector<16x1xf32>
    %cst_34 = arith.constant 3.200000e+01 : f32
    %77 = vector.broadcast %cst_34 : f32 to vector<16x1xf32>
    %78 = arith.divf %76, %77 : vector<16x1xf32>
    %cst_35 = arith.constant 9.99999974E-6 : f32
    %79 = vector.broadcast %cst_35 : f32 to vector<16x1xf32>
    %80 = arith.addf %78, %79 : vector<16x1xf32>
    %81 = math.rsqrt %80 : vector<16x1xf32>
    %82 = vector.broadcast %66 : vector<1x32xf32> to vector<16x32xf32>
    %83 = vector.broadcast %81 : vector<16x1xf32> to vector<16x32xf32>
    %84 = arith.mulf %82, %83 : vector<16x32xf32>
    %85 = arith.mulf %73, %84 : vector<16x32xf32>
    %86 = vector.broadcast %67 : vector<1x32xf32> to vector<16x32xf32>
    %87 = arith.addf %85, %86 : vector<16x32xf32>
    %c0_36 = arith.constant 0 : index
    %c0_37 = arith.constant 0 : index
    %88 = vector.load %arg2[%c0_36, %c0_37] : memref<16x4xf32, #tpu.memory_space<vmem>>, vector<16x4xf32>
    %c9 = arith.constant 9 : index
    %c0_38 = arith.constant 0 : index
    %89 = vector.load %arg6[%c9, %c0_38] : memref<16x128xf32, #tpu.memory_space<vmem>>, vector<1x32xf32>
    %90 = vector.extract_strided_slice %88 {offsets = [0, 0], sizes = [16, 1], strides = [1, 1]} : vector<16x4xf32> to vector<16x1xf32>
    %c12 = arith.constant 12 : index
    %c0_39 = arith.constant 0 : index
    %91 = vector.load %arg6[%c12, %c0_39] : memref<16x128xf32, #tpu.memory_space<vmem>>, vector<1x32xf32>
    %92 = vector.broadcast %90 : vector<16x1xf32> to vector<16x32xf32>
    %93 = vector.broadcast %91 : vector<1x32xf32> to vector<16x32xf32>
    %94 = arith.mulf %92, %93 : vector<16x32xf32>
    %95 = vector.broadcast %89 : vector<1x32xf32> to vector<16x32xf32>
    %96 = arith.addf %95, %94 : vector<16x32xf32>
    %97 = vector.extract_strided_slice %88 {offsets = [0, 1], sizes = [16, 1], strides = [1, 1]} : vector<16x4xf32> to vector<16x1xf32>
    %c13 = arith.constant 13 : index
    %c0_40 = arith.constant 0 : index
    %98 = vector.load %arg6[%c13, %c0_40] : memref<16x128xf32, #tpu.memory_space<vmem>>, vector<1x32xf32>
    %99 = vector.broadcast %97 : vector<16x1xf32> to vector<16x32xf32>
    %100 = vector.broadcast %98 : vector<1x32xf32> to vector<16x32xf32>
    %101 = arith.mulf %99, %100 : vector<16x32xf32>
    %102 = arith.addf %96, %101 : vector<16x32xf32>
    %103 = vector.extract_strided_slice %88 {offsets = [0, 2], sizes = [16, 1], strides = [1, 1]} : vector<16x4xf32> to vector<16x1xf32>
    %c14 = arith.constant 14 : index
    %c0_41 = arith.constant 0 : index
    %104 = vector.load %arg6[%c14, %c0_41] : memref<16x128xf32, #tpu.memory_space<vmem>>, vector<1x32xf32>
    %105 = vector.broadcast %103 : vector<16x1xf32> to vector<16x32xf32>
    %106 = vector.broadcast %104 : vector<1x32xf32> to vector<16x32xf32>
    %107 = arith.mulf %105, %106 : vector<16x32xf32>
    %108 = arith.addf %102, %107 : vector<16x32xf32>
    %109 = vector.extract_strided_slice %88 {offsets = [0, 3], sizes = [16, 1], strides = [1, 1]} : vector<16x4xf32> to vector<16x1xf32>
    %c15 = arith.constant 15 : index
    %c0_42 = arith.constant 0 : index
    %110 = vector.load %arg6[%c15, %c0_42] : memref<16x128xf32, #tpu.memory_space<vmem>>, vector<1x32xf32>
    %111 = vector.broadcast %109 : vector<16x1xf32> to vector<16x32xf32>
    %112 = vector.broadcast %110 : vector<1x32xf32> to vector<16x32xf32>
    %113 = arith.mulf %111, %112 : vector<16x32xf32>
    %114 = arith.addf %108, %113 : vector<16x32xf32>
    %cst_43 = arith.constant 0.000000e+00 : f32
    %115 = vector.broadcast %cst_43 : f32 to vector<16x32xf32>
    %116 = arith.maximumf %114, %115 : vector<16x32xf32>
    %117 = arith.addf %87, %116 : vector<16x32xf32>
    %cst_44 = arith.constant 0.000000e+00 : f32
    %118 = vector.broadcast %cst_44 : f32 to vector<16x32xf32>
    %119 = arith.maximumf %117, %118 : vector<16x32xf32>
    %c10 = arith.constant 10 : index
    %c0_45 = arith.constant 0 : index
    %120 = vector.load %arg6[%c10, %c0_45] : memref<16x128xf32, #tpu.memory_space<vmem>>, vector<1x32xf32>
    %121 = vector.broadcast %120 : vector<1x32xf32> to vector<16x32xf32>
    %122 = arith.mulf %119, %121 : vector<16x32xf32>
    %cst_46 = arith.constant dense<0.000000e+00> : vector<16xf32>
    %123 = vector.multi_reduction <add>, %122, %cst_46 [1] : vector<16x32xf32> to vector<16xf32>
    %124 = vector.shape_cast %123 : vector<16xf32> to vector<16x1xf32>
    %c11 = arith.constant 11 : index
    %c0_47 = arith.constant 0 : index
    %125 = vector.load %arg6[%c11, %c0_47] : memref<16x128xf32, #tpu.memory_space<vmem>>, vector<1x1xf32>
    %126 = vector.broadcast %125 : vector<1x1xf32> to vector<16x1xf32>
    %127 = arith.addf %124, %126 : vector<16x1xf32>
    %c0_48 = arith.constant 0 : index
    %c0_49 = arith.constant 0 : index
    %128 = vector.load %arg7[%c0_48, %c0_49] : memref<16x1xf32, #tpu.memory_space<vmem>>, vector<16x1xf32>
    tpu.vector_store %arg7[%c0_48, %c0_49], %127 {strides = array<i32>} : memref<16x1xf32, #tpu.memory_space<vmem>>, vector<16x1xf32>,
    return
  }
  func.func @transform_0(%arg0: i32) -> (i32, i32) {
    %c0_i32 = arith.constant 0 : i32
    %c0_i32_0 = arith.constant 0 : i32
    return %arg0, %c0_i32 : i32, i32
  }
  func.func @transform_1(%arg0: i32) -> (i32, i32) {
    %c0_i32 = arith.constant 0 : i32
    %c0_i32_0 = arith.constant 0 : i32
    return %arg0, %c0_i32 : i32, i32
  }
  func.func @transform_2(%arg0: i32) -> (i32, i32) {
    %c0_i32 = arith.constant 0 : i32
    %c0_i32_0 = arith.constant 0 : i32
    %c0_i32_1 = arith.constant 0 : i32
    return %c0_i32, %c0_i32_0 : i32, i32
  }
  func.func @transform_3(%arg0: i32) -> (i32, i32) {
    %c0_i32 = arith.constant 0 : i32
    %c0_i32_0 = arith.constant 0 : i32
    %c0_i32_1 = arith.constant 0 : i32
    return %c0_i32, %c0_i32_0 : i32, i32
  }
  func.func @transform_4(%arg0: i32) -> (i32, i32) {
    %c0_i32 = arith.constant 0 : i32
    %c0_i32_0 = arith.constant 0 : i32
    %c0_i32_1 = arith.constant 0 : i32
    return %c0_i32, %c0_i32_0 : i32, i32
  }
  func.func @transform_5(%arg0: i32) -> (i32, i32) {
    %c0_i32 = arith.constant 0 : i32
    %c0_i32_0 = arith.constant 0 : i32
    %c0_i32_1 = arith.constant 0 : i32
    return %c0_i32, %c0_i32_0 : i32, i32
  }
  func.func @transform_6(%arg0: i32) -> (i32, i32) {
    %c0_i32 = arith.constant 0 : i32
    %c0_i32_0 = arith.constant 0 : i32
    return %arg0, %c0_i32 : i32, i32
  }
}

</mosaic_0001>

<bundles_post_ra>
// kernel: tpu_custom_call.1
= control target key start
LH: loop header
LB: loop body
LE: loop exit
PB: predicated region body
PF: predicated region fallthrough
CT: control target
= control target key end

     0   :  { %s930_s21 = smov 0   ;;  %s1045_s0 = inlined_call_operand.vmem [shape: bf16[32,16], index: 0, kind: input, shape index: {}]   ;;  %s1046_s1 = inlined_call_operand.vmem [shape: f32[32,4], index: 1, kind: input, shape index: {}]   ;;  %s1047_s2 = inlined_call_operand.vmem [shape: bf16[16,32], index: 2, kind: input, shape index: {}]   ;;  %s1048_s3 = inlined_call_operand.vmem [shape: bf16[32,32], index: 3, kind: input, shape index: {}]   ;;  %s1049_s4 = inlined_call_operand.vmem [shape: bf16[32,32], index: 4, kind: input, shape index: {}]   ;;  %s1050_s5 = inlined_call_operand.vmem [shape: f32[16,128], index: 5, kind: input, shape index: {}]   ;;  %s1051_s6 = inlined_call_operand.vmem [shape: f32[32,1], index: 6, kind: output, shape index: {}]  }
   0x1 LB: > { %s775_s22 = sadd.s32 4294967295, %s887_s21   ;;  %p779_p0 = scmp.ge.s32.totalorder %s887_s21, 1  ;;  %s887_s21 = sphi %s930_s21, %s16_s21  }
   0x2   : > { %p224_p1 = scmp.lt.s32.totalorder %s887_s21, 3 }
   0x4   : > { %p225_p2 = pnand %p779_p0, %p224_p1 }
   0x5   : > { %s780_s25 = sshll.u32 (!%p225_p2), %s775_s22, 1 }
   0x6   : > { %228 = sbr.rel (%p225_p2) target bundleno = 1693 (0x69d), region = 44  ;;  %p260_p3 = scmp.lt.s32.totalorder (!%p225_p2), %s780_s25, 3 }
   0xb   : > { %v863_v0 = vld [vmem:[%s1047_s2] sm:$0xff]   ;;  %v889_v1 = vmov 0.0   ;;  %vm890_vm0 = vmmov 0   ;;  %s1053_s25 = smov (!%p260_p3, %s780_s25), 3  ;;  %vm298_vm1 = vcmask 130048   ;;  %vm345_vm2 = vcmask 261120  }
   0xc   : > { %821 = vmatprep.subr.bf16.mxu0 %v889_v1  ;;  %827 = vmatprep.subr.bf16.mxu1 %v889_v1  ;;  %s781_s26 = sshll.u32 %s1053_s25, 2  ;;  %v786_v3 = vld [vmem:[%s1050_s5] ss:$0 sm:$0xff]  ;;  %v865_v22 = vld [vmem:[%s1048_s3 + $0x8] sm:$0xff]   ;;  %v790_v30 = vld [vmem:[%s1050_s5 + $0x1] ss:$0 sm:$0xff] }
   0xd   : > { %822 = vmatpush3.bf16.msra.mxu0 %v863_v0  ;;  %823 = vmatprep.mubr.msk.bf16.mxu0 %vm890_vm0, %v889_v1  ;;  %s263_s29 = scalar_lea.vmem %s1045_s0, %s781_s26  ;;  %v866_v23 = vld [vmem:[%s1048_s3] sm:$0xff]   ;;  %v867_v62 = vld [vmem:[%s1049_s4 + $0x8] sm:$0xff]   ;;  %s783_s30 = sshll.u32 %s1053_s25, 3  ;;  %vm704_vm3 = vcmask 7168  }
   0xe   : > { %831 = vmatprep.mubr.msk.bf16.mxu1 %vm890_vm0, %v889_v1  ;;  %835 = vmatprep.subr.bf16.mxu0 %v889_v1  ;;  %v864_v2 = vld [vmem:[%s263_s29] sm:$0xff]   ;;  %s269_s9 = scalar_lea.vmem %s1046_s1, %s783_s30 }
   0xf   : > { %828 = vmatpush3.bf16.msra.mxu1 %v865_v22  ;;  %v791_v35 = vld [vmem:[%s1050_s5 + $0x2] ss:$0 sm:$0xff]  ;;  %v792_v43 = vld [vmem:[%s1050_s5 + $0x3] ss:$0 sm:$0xff] }
  0x10   : > { %824 = vmatmul.mubr.msk.bf16.vlgmr.msra.gmra.mxu0 %vm298_vm1, %v864_v2  ;;  %829 = vmatprep.subr.bf16.mxu1 %v889_v1  ;;  %v868_v63 = vld [vmem:[%s1049_s4] sm:$0xff]  }
  0x11   : > { %839 = vmatprep.mubr.msk.bf16.mxu0 %vm890_vm0, %v889_v1  ;;  %836 = vmatpush3.bf16.msra.mxu0 %v867_v62 }
  0x12   : > { %837 = vmatprep.subr.bf16.mxu0 %v889_v1  ;;  %v797_v1 = vld [vmem:[%s1050_s5 + $0x5] ss:$0 sm:$0xff] }
  0x13   : > { %830 = vmatpush3.bf16.msra.mxu1 %v866_v23 }
  0x15   : > { %838 = vmatpush3.bf16.msra.mxu0 %v868_v63 }
  0xd0   : > { %v336_v4 = vpop.f32.mrf.mxu0 }
  0xd1   : > { %v337_v5 = vadd.f32 %v786_v3, %v336_v4 }
  0xd2   : > { %v825_v6 = vpop.f32.mrf.mxu0 }
  0xd3   : > { %v346_v7 = vsel %vm345_vm2, %v337_v5, 0.0 }
  0xd4   : > { %347 = vadd.xlane.f32.xlu0 %v346_v7  ;;  %v339_v8 = vpop.f32.mrf.mxu0  ;;  %v796_v7 = vld [vmem:[%s1050_s5 + $0x4] ss:$0 sm:$0xff] }
  0xd5   : > { %v340_v9 = vadd.f32 %v786_v3, %v339_v8 }
  0xd6   : > { %v826_v10 = vpop.f32.mrf.mxu0 }
  0xd7   : > { %v349_v11 = vsel %vm345_vm2, %v340_v9, 0.0 }
  0xd8   : > { %350 = vadd.xlane.f32.xlu0 %v349_v11 }
 0x15d   : > { %v348_v12 = vpop.xlane.xlu0 %347 }
 0x15e   : > { %v353_v13 = vmul.f32 0.03125, %v348_v12 }
 0x160   : > { %v355_v14 = vsub.f32 %v337_v5, %v353_v13 }
 0x161   : > { %v351_v15 = vpop.xlane.xlu0 %350 }
 0x162   : > { %v354_v16 = vmul.f32 0.03125, %v351_v15  ;;  %v357_v17 = vmul.f32 %v355_v14, %v355_v14 }
 0x164   : > { %v356_v18 = vsub.f32 %v340_v9, %v354_v16  ;;  %v359_v19 = vsel %vm345_vm2, %v357_v17, 0.0 }
 0x165   : > { %360 = vadd.xlane.f32.xlu1 %v359_v19  ;;  %v891_v19 = vmov 0  }
 0x166   : > { %v358_v20 = vmul.f32 %v356_v18, %v356_v18  ;;  %858 = vset.pattern.permute.xlu1 %v891_v19  ;;  %857 = vset.pattern.permute.xlu0 %v891_v19 }
 0x168   : > { %v362_v21 = vsel %vm345_vm2, %v358_v20, 0.0  ;;  %v798_v20 = vld [vmem:[%s1050_s5 + $0x6] ss:$0 sm:$0xff] }
 0x169   : > { %363 = vadd.xlane.f32.xlu1 %v362_v21 }
 0x1ee   : > { %v361_v24 = vpop.xlane.xlu1 %360 }
 0x1ef   : > { %v365_v25 = vmul.f32 0.03125, %v361_v24 }
 0x1f1   : > { %v367_v26 = vadd.f32 1e-05, %v365_v25 }
 0x1f2   : > { %v364_v27 = vpop.xlane.xlu1 %363 }
 0x1f3   : > { %869 = vrsqrt.f32 %v367_v26  ;;  %v366_v28 = vmul.f32 0.03125, %v364_v27 }
 0x1f5   : > { %v368_v29 = vadd.f32 1e-05, %v366_v28 }
 0x1f7   : > { %871 = vrsqrt.f32 %v368_v29  ;;  %v602_v29 = vld [vmem:[%s269_s9 + $0x8] sm:$0xff] }
 0x200   : > { %v870_v31 = vpop.eup %869 }
 0x201   : > { %v375_v32 = vmul.f32 %v870_v31, %v790_v30  ;;  %v892_v31 = vmov 1  }
 0x203   : > { %v377_v33 = vmul.f32 %v375_v32, %v355_v14  ;;  %v893_v32 = vmov 2  }
 0x204   : > { %v872_v34 = vpop.eup %871 }
 0x205   : > { %v376_v36 = vmul.f32 %v872_v34, %v790_v30  ;;  %v383_v38 = vadd.f32 %v791_v35, %v377_v33  ;;  %v601_v30 = vld [vmem:[%s269_s9] sm:$0xff]  ;;  %v894_v33 = vmov 3   ;;  %s275_s9 = scalar_lea.vmem %s1051_s6, %s783_s30 }
 0x207   : > { %v378_v37 = vmul.f32 %v376_v36, %v356_v18  ;;  %v385_v40 = vmax.f32 %v383_v38, 0.0 }
 0x209   : > { %v384_v39 = vadd.f32 %v791_v35, %v378_v37 }
 0x20b   : > { %v386_v41 = vmax.f32 %v384_v39, 0.0 }
 0x20d   : > { %v387_v42 = vpack.c.bf16 %v386_v41, %v385_v40 }
 0x20f   : > { %832 = vmatmul.mubr.msk.bf16.vlgmr.msra.gmra.mxu1 %vm345_vm2, %v387_v42 }
 0x2cf   : > { %v446_v44 = vpop.f32.mrf.mxu1 }
 0x2d0   : > { %v447_v45 = vadd.f32 %v792_v43, %v446_v44 }
 0x2d1   : > { %v833_v46 = vpop.f32.mrf.mxu1 }
 0x2d2   : > { %v455_v47 = vsel %vm345_vm2, %v447_v45, 0.0 }
 0x2d3   : > { %456 = vadd.xlane.f32.xlu0 %v455_v47  ;;  %v449_v48 = vpop.f32.mrf.mxu1 }
 0x2d4   : > { %v450_v49 = vadd.f32 %v792_v43, %v449_v48 }
 0x2d5   : > { %v834_v50 = vpop.f32.mrf.mxu1 }
 0x2d6   : > { %v458_v51 = vsel %vm345_vm2, %v450_v49, 0.0 }
 0x2d7   : > { %459 = vadd.xlane.f32.xlu1 %v458_v51 }
 0x35c   : > { %v457_v52 = vpop.xlane.xlu0 %456 }
 0x35d   : > { %v461_v53 = vmul.f32 0.03125, %v457_v52 }
 0x35f   : > { %v463_v54 = vsub.f32 %v447_v45, %v461_v53 }
 0x360   : > { %v460_v55 = vpop.xlane.xlu1 %459 }
 0x361   : > { %v462_v56 = vmul.f32 0.03125, %v460_v55  ;;  %v465_v57 = vmul.f32 %v463_v54, %v463_v54  ;;  %v804_v55 = vld [vmem:[%s1050_s5 + $0xc] ss:$0 sm:$0xff] }
 0x363   : > { %v464_v58 = vsub.f32 %v450_v49, %v462_v56  ;;  %v467_v59 = vsel %vm345_vm2, %v465_v57, 0.0 }
 0x364   : > { %468 = vadd.xlane.f32.xlu0 %v467_v59 }
 0x365   : > { %v466_v60 = vmul.f32 %v464_v58, %v464_v58 }
 0x367   : > { %v470_v61 = vsel %vm345_vm2, %v466_v60, 0.0  ;;  %v805_v60 = vld [vmem:[%s1050_s5 + $0x9] ss:$0 sm:$0xff] }
 0x368   : > { %471 = vadd.xlane.f32.xlu1 %v470_v61  ;;  %v806_v61 = vld [vmem:[%s1050_s5 + $0xd] ss:$0 sm:$0xff] }
 0x3ed   : > { %v469_v0 = vpop.xlane.xlu0 %468 }
 0x3ee   : > { %v473_v2 = vmul.f32 0.03125, %v469_v0  ;;  %v807_v0 = vld [vmem:[%s1050_s5 + $0xe] ss:$0 sm:$0xff] }
 0x3f0   : > { %v475_v3 = vadd.f32 1e-05, %v473_v2 }
 0x3f1   : > { %v472_v4 = vpop.xlane.xlu1 %471 }
 0x3f2   : > { %873 = vrsqrt.f32 %v475_v3  ;;  %v474_v5 = vmul.f32 0.03125, %v472_v4 }
 0x3f4   : > { %v476_v6 = vadd.f32 1e-05, %v474_v5 }
 0x3f6   : > { %875 = vrsqrt.f32 %v476_v6  ;;  %v808_v6 = vld [vmem:[%s1050_s5 + $0xf] ss:$0 sm:$0xff] }
 0x3ff   : > { %v874_v8 = vpop.eup %873 }
 0x400   : > { %v483_v9 = vmul.f32 %v874_v8, %v796_v7 }
 0x402   : > { %v485_v10 = vmul.f32 %v483_v9, %v463_v54  ;;  %v802_v9 = vld [vmem:[%s1050_s5 + $0x7] ss:$0 sm:$0xff] }
 0x403   : > { %v876_v11 = vpop.eup %875 }
 0x404   : > { %v484_v12 = vmul.f32 %v876_v11, %v796_v7  ;;  %v491_v14 = vadd.f32 %v797_v1, %v485_v10 }
 0x406   : > { %v486_v13 = vmul.f32 %v484_v12, %v464_v58  ;;  %v493_v16 = vmax.f32 %v491_v14, 0.0 }
 0x408   : > { %v492_v15 = vadd.f32 %v797_v1, %v486_v13 }
 0x40a   : > { %v494_v17 = vmax.f32 %v492_v15, 0.0 }
 0x40c   : > { %v495_v18 = vpack.c.bf16 %v494_v17, %v493_v16  ;;  %v803_v16 = vld [vmem:[%s1050_s5 + $0x8] ss:$0 sm:$0xff] }
 0x40e   : > { %840 = vmatmul.mubr.msk.bf16.vlgmr.msra.gmra.mxu0 %vm345_vm2, %v495_v18 }
 0x4ce   : > { %v554_v21 = vpop.f32.mrf.mxu0 }
 0x4cf   : > { %v555_v22 = vadd.f32 %v798_v20, %v554_v21 }
 0x4d0   : > { %v841_v23 = vpop.f32.mrf.mxu0 }
 0x4d1   : > { %v563_v24 = vsel %vm345_vm2, %v555_v22, 0.0 }
 0x4d2   : > { %564 = vadd.xlane.f32.xlu0 %v563_v24  ;;  %v557_v25 = vpop.f32.mrf.mxu0 }
 0x4d3   : > { %v558_v26 = vadd.f32 %v798_v20, %v557_v25 }
 0x4d4   : > { %v842_v27 = vpop.f32.mrf.mxu0 }
 0x4d5   : > { %v566_v28 = vsel %vm345_vm2, %v558_v26, 0.0 }
 0x4d6   : > { %567 = vadd.xlane.f32.xlu1 %v566_v28 }
 0x4e7   : > { %612 = vperm.xlu1 %858, %v602_v29  }
 0x4eb   : > { %859 = vset.pattern.permute.xlu1 %v892_v31 }
 0x4ec   : > { %629 = vperm.xlu1 %859, %v601_v30  }
 0x4f0   : > { %633 = vperm.xlu1 %859, %v602_v29  }
 0x4f4   : > { %860 = vset.pattern.permute.xlu1 %v893_v32 }
 0x4f5   : > { %646 = vperm.xlu1 %860, %v601_v30  }
 0x4f9   : > { %650 = vperm.xlu1 %860, %v602_v29  }
 0x4fd   : > { %861 = vset.pattern.permute.xlu1 %v894_v33 }
 0x4fe   : > { %663 = vperm.xlu1 %861, %v601_v30  }
 0x55b   : > { %v565_v34 = vpop.xlane.xlu0 %564 }
 0x55c   : > { %v569_v35 = vmul.f32 0.03125, %v565_v34 }
 0x55e   : > { %v571_v36 = vsub.f32 %v555_v22, %v569_v35 }
 0x55f   : > { %v568_v37 = vpop.xlane.xlu1 %567 }
 0x560   : > { %v570_v38 = vmul.f32 0.03125, %v568_v37  ;;  %v573_v39 = vmul.f32 %v571_v36, %v571_v36 }
 0x562   : > { %v572_v40 = vsub.f32 %v558_v26, %v570_v38  ;;  %v575_v41 = vsel %vm345_vm2, %v573_v39, 0.0  ;;  %v809_v26 = vld [vmem:[%s1050_s5 + $0xa] ss:$0 sm:$0xff] }
 0x563   : > { %576 = vadd.xlane.f32.xlu0 %v575_v41  ;;  %v613_v44 = vpop.permute.xlu1 %612 }
 0x564   : > { %v574_v42 = vmul.f32 %v572_v40, %v572_v40  ;;  %v620_v58 = vmul.f32 %v804_v55, %v613_v44 }
 0x566   : > { %v578_v43 = vsel %vm345_vm2, %v574_v42, 0.0  ;;  %v626_v2 = vadd.f32 %v805_v60, %v620_v58 }
 0x567   : > { %579 = vadd.xlane.f32.xlu1 %v578_v43  ;;  %v630_v45 = vpop.permute.xlu1 %629 }
 0x568   : > { %v640_v62 = vmul.f32 %v806_v61, %v630_v45 }
 0x56b   : > { %v634_v46 = vpop.permute.xlu1 %633 }
 0x56c   : > { %v641_v3 = vmul.f32 %v806_v61, %v634_v46 }
 0x56e   : > { %v643_v10 = vadd.f32 %v641_v3, %v626_v2 }
 0x570   : > { %v647_v47 = vpop.permute.xlu1 %646 }
 0x571   : > { %v657_v4 = vmul.f32 %v807_v0, %v647_v47 }
 0x574   : > { %v651_v48 = vpop.permute.xlu1 %650 }
 0x575   : > { %v658_v11 = vmul.f32 %v807_v0, %v651_v48 }
 0x577   : > { %v660_v17 = vadd.f32 %v658_v11, %v643_v10 }
 0x578   : > { %667 = vperm.xlu1 %861, %v602_v29  }
 0x579   : > { %607 = vperm.xlu0 %857, %v601_v30   ;;  %v664_v49 = vpop.permute.xlu1 %663 }
 0x57a   : > { %v674_v1 = vmul.f32 %v808_v6, %v664_v49 }
 0x57d   : > { %862 = vset.pattern.permute.xlu0 %v894_v33 }
 0x5ec   : > { %v577_v50 = vpop.xlane.xlu0 %576 }
 0x5ed   : > { %v581_v51 = vmul.f32 0.03125, %v577_v50 }
 0x5ef   : > { %v583_v52 = vadd.f32 1e-05, %v581_v51 }
 0x5f0   : > { %v580_v53 = vpop.xlane.xlu1 %579 }
 0x5f1   : > { %877 = vrsqrt.f32 %v583_v52  ;;  %v582_v54 = vmul.f32 0.03125, %v580_v53 }
 0x5f3   : > { %v584_v56 = vadd.f32 1e-05, %v582_v54 }
 0x5f4   : > { %v608_v57 = vpop.permute.xlu0 %607  ;;  %v668_v8 = vpop.permute.xlu1 %667 }
 0x5f5   : > { %879 = vrsqrt.f32 %v584_v56  ;;  %v619_v59 = vmul.f32 %v804_v55, %v608_v57  ;;  %v675_v13 = vmul.f32 %v808_v6, %v668_v8 }
 0x5f7   : > { %v625_v63 = vadd.f32 %v805_v60, %v619_v59  ;;  %v677_v20 = vadd.f32 %v675_v13, %v660_v17 }
 0x5f9   : > { %v642_v5 = vadd.f32 %v640_v62, %v625_v63  ;;  %v679_v27 = vmax.f32 %v677_v20, 0.0 }
 0x5fb   : > { %v659_v7 = vadd.f32 %v657_v4, %v642_v5 }
 0x5fd   : > { %v676_v15 = vadd.f32 %v674_v1, %v659_v7 }
 0x5fe   : > { %v878_v12 = vpop.eup %877 }
 0x5ff   : > { %v591_v14 = vmul.f32 %v878_v12, %v802_v9  ;;  %v678_v22 = vmax.f32 %v676_v15, 0.0 }
 0x601   : > { %v593_v18 = vmul.f32 %v591_v14, %v571_v36  ;;  %v810_v36 = vld [vmem:[%s1050_s5 + $0xb] ss:$0 sm:$0xff] }
 0x602   : > { %v880_v19 = vpop.eup %879 }
 0x603   : > { %v599_v21 = vadd.f32 %v803_v16, %v593_v18  ;;  %v592_v23 = vmul.f32 %v880_v19, %v802_v9 }
 0x605   : > { %v680_v24 = vadd.f32 %v678_v22, %v599_v21  ;;  %v594_v25 = vmul.f32 %v592_v23, %v572_v40 }
 0x607   : > { %v682_v28 = vmax.f32 %v680_v24, 0.0  ;;  %v600_v29 = vadd.f32 %v803_v16, %v594_v25 }
 0x609   : > { %v689_v30 = vmul.f32 %v809_v26, %v682_v28  ;;  %v681_v31 = vadd.f32 %v679_v27, %v600_v29 }
 0x60b   : > { %v691_v32 = vsel %vm345_vm2, %v689_v30, 0.0  ;;  %v683_v33 = vmax.f32 %v681_v31, 0.0 }
 0x60c   : > { %692 = vadd.xlane.f32.xlu1 %v691_v32 }
 0x60d   : > { %v690_v34 = vmul.f32 %v809_v26, %v683_v33 }
 0x60f   : > { %v694_v35 = vsel %vm345_vm2, %v690_v34, 0.0 }
 0x610   : > { %695 = vadd.xlane.f32.xlu0 %v694_v35 }
 0x695   : > { %v693_v37 = vpop.xlane.xlu1 %692 }
 0x696   : > { %v702_v38 = vadd.f32 %v810_v36, %v693_v37 }
 0x698   : > { %705 = vst.msk [vmem:[%s275_s9] sm:$0xff] %vm704_vm3, %v702_v38 }
 0x699   : > { %v696_v39 = vpop.xlane.xlu0 %695 }
 0x69a   : > { %v703_v40 = vadd.f32 %v810_v36, %v696_v39 }
 0x69c   : > { %706 = vst.msk [vmem:[%s275_s9 + $0x8] sm:$0xff] %vm704_vm3, %v703_v40 }
 0x69d PF: > { %s16_s21 = sadd.s32 1, %s887_s21  }
 0x69e   : > { %p13_p4 = scmp.ge.s32.totalorder %s16_s21, 4  }
 0x6a0   :  { %15 = sbr.rel (!%p13_p4) target bundleno = 1 (0x1), region = 77 }

// kernel: tpu_custom_call.1
= control target key start
LH: loop header
LB: loop body
LE: loop exit
PB: predicated region body
PF: predicated region fallthrough
CT: control target
= control target key end

     0   :  { %s930_s21 = smov 0   ;;  %s1045_s0 = inlined_call_operand.vmem [shape: bf16[32,16], index: 0, kind: input, shape index: {}]   ;;  %s1046_s1 = inlined_call_operand.vmem [shape: f32[32,4], index: 1, kind: input, shape index: {}]   ;;  %s1047_s2 = inlined_call_operand.vmem [shape: bf16[16,32], index: 2, kind: input, shape index: {}]   ;;  %s1048_s3 = inlined_call_operand.vmem [shape: bf16[32,32], index: 3, kind: input, shape index: {}]   ;;  %s1049_s4 = inlined_call_operand.vmem [shape: bf16[32,32], index: 4, kind: input, shape index: {}]   ;;  %s1050_s5 = inlined_call_operand.vmem [shape: f32[16,128], index: 5, kind: input, shape index: {}]   ;;  %s1051_s6 = inlined_call_operand.vmem [shape: f32[32,1], index: 6, kind: output, shape index: {}]  }
   0x1 LB: > { %s775_s22 = sadd.s32 4294967295, %s887_s21   ;;  %p779_p0 = scmp.ge.s32.totalorder %s887_s21, 1  ;;  %s887_s21 = sphi %s930_s21, %s16_s21  }
   0x2   : > { %p224_p1 = scmp.lt.s32.totalorder %s887_s21, 3 }
   0x4   : > { %p225_p2 = pnand %p779_p0, %p224_p1 }
   0x5   : > { %s780_s25 = sshll.u32 (!%p225_p2), %s775_s22, 1 }
   0x6   : > { %228 = sbr.rel (%p225_p2) target bundleno = 1693 (0x69d), region = 44  ;;  %p260_p3 = scmp.lt.s32.totalorder (!%p225_p2), %s780_s25, 3 }
   0xb   : > { %v863_v0 = vld [vmem:[%s1047_s2] sm:$0xff]   ;;  %v889_v1 = vmov 0.0   ;;  %vm890_vm0 = vmmov 0   ;;  %s1053_s25 = smov (!%p260_p3, %s780_s25), 3  ;;  %vm298_vm1 = vcmask 130048   ;;  %vm345_vm2 = vcmask 261120  }
   0xc   : > { %821 = vmatprep.subr.bf16.mxu0 %v889_v1  ;;  %827 = vmatprep.subr.bf16.mxu1 %v889_v1  ;;  %s781_s26 = sshll.u32 %s1053_s25, 2  ;;  %v786_v3 = vld [vmem:[%s1050_s5] ss:$0 sm:$0xff]  ;;  %v865_v22 = vld [vmem:[%s1048_s3 + $0x8] sm:$0xff]   ;;  %v790_v30 = vld [vmem:[%s1050_s5 + $0x1] ss:$0 sm:$0xff] }
   0xd   : > { %822 = vmatpush3.bf16.msra.mxu0 %v863_v0  ;;  %823 = vmatprep.mubr.msk.bf16.mxu0 %vm890_vm0, %v889_v1  ;;  %s263_s29 = scalar_lea.vmem %s1045_s0, %s781_s26  ;;  %v866_v23 = vld [vmem:[%s1048_s3] sm:$0xff]   ;;  %v867_v62 = vld [vmem:[%s1049_s4 + $0x8] sm:$0xff]   ;;  %s783_s30 = sshll.u32 %s1053_s25, 3  ;;  %vm704_vm3 = vcmask 7168  }
   0xe   : > { %831 = vmatprep.mubr.msk.bf16.mxu1 %vm890_vm0, %v889_v1  ;;  %835 = vmatprep.subr.bf16.mxu0 %v889_v1  ;;  %v864_v2 = vld [vmem:[%s263_s29] sm:$0xff]   ;;  %s269_s9 = scalar_lea.vmem %s1046_s1, %s783_s30 }
   0xf   : > { %828 = vmatpush3.bf16.msra.mxu1 %v865_v22  ;;  %v791_v35 = vld [vmem:[%s1050_s5 + $0x2] ss:$0 sm:$0xff]  ;;  %v792_v43 = vld [vmem:[%s1050_s5 + $0x3] ss:$0 sm:$0xff] }
  0x10   : > { %824 = vmatmul.mubr.msk.bf16.vlgmr.msra.gmra.mxu0 %vm298_vm1, %v864_v2  ;;  %829 = vmatprep.subr.bf16.mxu1 %v889_v1  ;;  %v868_v63 = vld [vmem:[%s1049_s4] sm:$0xff]  }
  0x11   : > { %839 = vmatprep.mubr.msk.bf16.mxu0 %vm890_vm0, %v889_v1  ;;  %836 = vmatpush3.bf16.msra.mxu0 %v867_v62 }
  0x12   : > { %837 = vmatprep.subr.bf16.mxu0 %v889_v1  ;;  %v797_v1 = vld [vmem:[%s1050_s5 + $0x5] ss:$0 sm:$0xff] }
  0x13   : > { %830 = vmatpush3.bf16.msra.mxu1 %v866_v23 }
  0x15   : > { %838 = vmatpush3.bf16.msra.mxu0 %v868_v63 }
  0xd0   : > { %v336_v4 = vpop.f32.mrf.mxu0 }
  0xd1   : > { %v337_v5 = vadd.f32 %v786_v3, %v336_v4 }
  0xd2   : > { %v825_v6 = vpop.f32.mrf.mxu0 }
  0xd3   : > { %v346_v7 = vsel %vm345_vm2, %v337_v5, 0.0 }
  0xd4   : > { %347 = vadd.xlane.f32.xlu0 %v346_v7  ;;  %v339_v8 = vpop.f32.mrf.mxu0  ;;  %v796_v7 = vld [vmem:[%s1050_s5 + $0x4] ss:$0 sm:$0xff] }
  0xd5   : > { %v340_v9 = vadd.f32 %v786_v3, %v339_v8 }
  0xd6   : > { %v826_v10 = vpop.f32.mrf.mxu0 }
  0xd7   : > { %v349_v11 = vsel %vm345_vm2, %v340_v9, 0.0 }
  0xd8   : > { %350 = vadd.xlane.f32.xlu0 %v349_v11 }
 0x15d   : > { %v348_v12 = vpop.xlane.xlu0 %347 }
 0x15e   : > { %v353_v13 = vmul.f32 0.03125, %v348_v12 }
 0x160   : > { %v355_v14 = vsub.f32 %v337_v5, %v353_v13 }
 0x161   : > { %v351_v15 = vpop.xlane.xlu0 %350 }
 0x162   : > { %v354_v16 = vmul.f32 0.03125, %v351_v15  ;;  %v357_v17 = vmul.f32 %v355_v14, %v355_v14 }
 0x164   : > { %v356_v18 = vsub.f32 %v340_v9, %v354_v16  ;;  %v359_v19 = vsel %vm345_vm2, %v357_v17, 0.0 }
 0x165   : > { %360 = vadd.xlane.f32.xlu1 %v359_v19  ;;  %v891_v19 = vmov 0  }
 0x166   : > { %v358_v20 = vmul.f32 %v356_v18, %v356_v18  ;;  %858 = vset.pattern.permute.xlu1 %v891_v19  ;;  %857 = vset.pattern.permute.xlu0 %v891_v19 }
 0x168   : > { %v362_v21 = vsel %vm345_vm2, %v358_v20, 0.0  ;;  %v798_v20 = vld [vmem:[%s1050_s5 + $0x6] ss:$0 sm:$0xff] }
 0x169   : > { %363 = vadd.xlane.f32.xlu1 %v362_v21 }
 0x1ee   : > { %v361_v24 = vpop.xlane.xlu1 %360 }
 0x1ef   : > { %v365_v25 = vmul.f32 0.03125, %v361_v24 }
 0x1f1   : > { %v367_v26 = vadd.f32 1e-05, %v365_v25 }
 0x1f2   : > { %v364_v27 = vpop.xlane.xlu1 %363 }
 0x1f3   : > { %869 = vrsqrt.f32 %v367_v26  ;;  %v366_v28 = vmul.f32 0.03125, %v364_v27 }
 0x1f5   : > { %v368_v29 = vadd.f32 1e-05, %v366_v28 }
 0x1f7   : > { %871 = vrsqrt.f32 %v368_v29  ;;  %v602_v29 = vld [vmem:[%s269_s9 + $0x8] sm:$0xff] }
 0x200   : > { %v870_v31 = vpop.eup %869 }
 0x201   : > { %v375_v32 = vmul.f32 %v870_v31, %v790_v30  ;;  %v892_v31 = vmov 1  }
 0x203   : > { %v377_v33 = vmul.f32 %v375_v32, %v355_v14  ;;  %v893_v32 = vmov 2  }
 0x204   : > { %v872_v34 = vpop.eup %871 }
 0x205   : > { %v376_v36 = vmul.f32 %v872_v34, %v790_v30  ;;  %v383_v38 = vadd.f32 %v791_v35, %v377_v33  ;;  %v601_v30 = vld [vmem:[%s269_s9] sm:$0xff]  ;;  %v894_v33 = vmov 3   ;;  %s275_s9 = scalar_lea.vmem %s1051_s6, %s783_s30 }
 0x207   : > { %v378_v37 = vmul.f32 %v376_v36, %v356_v18  ;;  %v385_v40 = vmax.f32 %v383_v38, 0.0 }
 0x209   : > { %v384_v39 = vadd.f32 %v791_v35, %v378_v37 }
 0x20b   : > { %v386_v41 = vmax.f32 %v384_v39, 0.0 }
 0x20d   : > { %v387_v42 = vpack.c.bf16 %v386_v41, %v385_v40 }
 0x20f   : > { %832 = vmatmul.mubr.msk.bf16.vlgmr.msra.gmra.mxu1 %vm345_vm2, %v387_v42 }
 0x2cf   : > { %v446_v44 = vpop.f32.mrf.mxu1 }
 0x2d0   : > { %v447_v45 = vadd.f32 %v792_v43, %v446_v44 }
 0x2d1   : > { %v833_v46 = vpop.f32.mrf.mxu1 }
 0x2d2   : > { %v455_v47 = vsel %vm345_vm2, %v447_v45, 0.0 }
 0x2d3   : > { %456 = vadd.xlane.f32.xlu0 %v455_v47  ;;  %v449_v48 = vpop.f32.mrf.mxu1 }
 0x2d4   : > { %v450_v49 = vadd.f32 %v792_v43, %v449_v48 }
 0x2d5   : > { %v834_v50 = vpop.f32.mrf.mxu1 }
 0x2d6   : > { %v458_v51 = vsel %vm345_vm2, %v450_v49, 0.0 }
 0x2d7   : > { %459 = vadd.xlane.f32.xlu1 %v458_v51 }
 0x35c   : > { %v457_v52 = vpop.xlane.xlu0 %456 }
 0x35d   : > { %v461_v53 = vmul.f32 0.03125, %v457_v52 }
 0x35f   : > { %v463_v54 = vsub.f32 %v447_v45, %v461_v53 }
 0x360   : > { %v460_v55 = vpop.xlane.xlu1 %459 }
 0x361   : > { %v462_v56 = vmul.f32 0.03125, %v460_v55  ;;  %v465_v57 = vmul.f32 %v463_v54, %v463_v54  ;;  %v804_v55 = vld [vmem:[%s1050_s5 + $0xc] ss:$0 sm:$0xff] }
 0x363   : > { %v464_v58 = vsub.f32 %v450_v49, %v462_v56  ;;  %v467_v59 = vsel %vm345_vm2, %v465_v57, 0.0 }
 0x364   : > { %468 = vadd.xlane.f32.xlu0 %v467_v59 }
 0x365   : > { %v466_v60 = vmul.f32 %v464_v58, %v464_v58 }
 0x367   : > { %v470_v61 = vsel %vm345_vm2, %v466_v60, 0.0  ;;  %v805_v60 = vld [vmem:[%s1050_s5 + $0x9] ss:$0 sm:$0xff] }
 0x368   : > { %471 = vadd.xlane.f32.xlu1 %v470_v61  ;;  %v806_v61 = vld [vmem:[%s1050_s5 + $0xd] ss:$0 sm:$0xff] }
 0x3ed   : > { %v469_v0 = vpop.xlane.xlu0 %468 }
 0x3ee   : > { %v473_v2 = vmul.f32 0.03125, %v469_v0  ;;  %v807_v0 = vld [vmem:[%s1050_s5 + $0xe] ss:$0 sm:$0xff] }
 0x3f0   : > { %v475_v3 = vadd.f32 1e-05, %v473_v2 }
 0x3f1   : > { %v472_v4 = vpop.xlane.xlu1 %471 }
 0x3f2   : > { %873 = vrsqrt.f32 %v475_v3  ;;  %v474_v5 = vmul.f32 0.03125, %v472_v4 }
 0x3f4   : > { %v476_v6 = vadd.f32 1e-05, %v474_v5 }
 0x3f6   : > { %875 = vrsqrt.f32 %v476_v6  ;;  %v808_v6 = vld [vmem:[%s1050_s5 + $0xf] ss:$0 sm:$0xff] }
 0x3ff   : > { %v874_v8 = vpop.eup %873 }
 0x400   : > { %v483_v9 = vmul.f32 %v874_v8, %v796_v7 }
 0x402   : > { %v485_v10 = vmul.f32 %v483_v9, %v463_v54  ;;  %v802_v9 = vld [vmem:[%s1050_s5 + $0x7] ss:$0 sm:$0xff] }
 0x403   : > { %v876_v11 = vpop.eup %875 }
 0x404   : > { %v484_v12 = vmul.f32 %v876_v11, %v796_v7  ;;  %v491_v14 = vadd.f32 %v797_v1, %v485_v10 }
 0x406   : > { %v486_v13 = vmul.f32 %v484_v12, %v464_v58  ;;  %v493_v16 = vmax.f32 %v491_v14, 0.0 }
 0x408   : > { %v492_v15 = vadd.f32 %v797_v1, %v486_v13 }
 0x40a   : > { %v494_v17 = vmax.f32 %v492_v15, 0.0 }
 0x40c   : > { %v495_v18 = vpack.c.bf16 %v494_v17, %v493_v16  ;;  %v803_v16 = vld [vmem:[%s1050_s5 + $0x8] ss:$0 sm:$0xff] }
 0x40e   : > { %840 = vmatmul.mubr.msk.bf16.vlgmr.msra.gmra.mxu0 %vm345_vm2, %v495_v18 }
 0x4ce   : > { %v554_v21 = vpop.f32.mrf.mxu0 }
 0x4cf   : > { %v555_v22 = vadd.f32 %v798_v20, %v554_v21 }
 0x4d0   : > { %v841_v23 = vpop.f32.mrf.mxu0 }
 0x4d1   : > { %v563_v24 = vsel %vm345_vm2, %v555_v22, 0.0 }
 0x4d2   : > { %564 = vadd.xlane.f32.xlu0 %v563_v24  ;;  %v557_v25 = vpop.f32.mrf.mxu0 }
 0x4d3   : > { %v558_v26 = vadd.f32 %v798_v20, %v557_v25 }
 0x4d4   : > { %v842_v27 = vpop.f32.mrf.mxu0 }
 0x4d5   : > { %v566_v28 = vsel %vm345_vm2, %v558_v26, 0.0 }
 0x4d6   : > { %567 = vadd.xlane.f32.xlu1 %v566_v28 }
 0x4e7   : > { %612 = vperm.xlu1 %858, %v602_v29  }
 0x4eb   : > { %859 = vset.pattern.permute.xlu1 %v892_v31 }
 0x4ec   : > { %629 = vperm.xlu1 %859, %v601_v30  }
 0x4f0   : > { %633 = vperm.xlu1 %859, %v602_v29  }
 0x4f4   : > { %860 = vset.pattern.permute.xlu1 %v893_v32 }
 0x4f5   : > { %646 = vperm.xlu1 %860, %v601_v30  }
 0x4f9   : > { %650 = vperm.xlu1 %860, %v602_v29  }
 0x4fd   : > { %861 = vset.pattern.permute.xlu1 %v894_v33 }
 0x4fe   : > { %663 = vperm.xlu1 %861, %v601_v30  }
 0x55b   : > { %v565_v34 = vpop.xlane.xlu0 %564 }
 0x55c   : > { %v569_v35 = vmul.f32 0.03125, %v565_v34 }
 0x55e   : > { %v571_v36 = vsub.f32 %v555_v22, %v569_v35 }
 0x55f   : > { %v568_v37 = vpop.xlane.xlu1 %567 }
 0x560   : > { %v570_v38 = vmul.f32 0.03125, %v568_v37  ;;  %v573_v39 = vmul.f32 %v571_v36, %v571_v36 }
 0x562   : > { %v572_v40 = vsub.f32 %v558_v26, %v570_v38  ;;  %v575_v41 = vsel %vm345_vm2, %v573_v39, 0.0  ;;  %v809_v26 = vld [vmem:[%s1050_s5 + $0xa] ss:$0 sm:$0xff] }
 0x563   : > { %576 = vadd.xlane.f32.xlu0 %v575_v41  ;;  %v613_v44 = vpop.permute.xlu1 %612 }
 0x564   : > { %v574_v42 = vmul.f32 %v572_v40, %v572_v40  ;;  %v620_v58 = vmul.f32 %v804_v55, %v613_v44 }
 0x566   : > { %v578_v43 = vsel %vm345_vm2, %v574_v42, 0.0  ;;  %v626_v2 = vadd.f32 %v805_v60, %v620_v58 }
 0x567   : > { %579 = vadd.xlane.f32.xlu1 %v578_v43  ;;  %v630_v45 = vpop.permute.xlu1 %629 }
 0x568   : > { %v640_v62 = vmul.f32 %v806_v61, %v630_v45 }
 0x56b   : > { %v634_v46 = vpop.permute.xlu1 %633 }
 0x56c   : > { %v641_v3 = vmul.f32 %v806_v61, %v634_v46 }
 0x56e   : > { %v643_v10 = vadd.f32 %v641_v3, %v626_v2 }
 0x570   : > { %v647_v47 = vpop.permute.xlu1 %646 }
 0x571   : > { %v657_v4 = vmul.f32 %v807_v0, %v647_v47 }
 0x574   : > { %v651_v48 = vpop.permute.xlu1 %650 }
 0x575   : > { %v658_v11 = vmul.f32 %v807_v0, %v651_v48 }
 0x577   : > { %v660_v17 = vadd.f32 %v658_v11, %v643_v10 }
 0x578   : > { %667 = vperm.xlu1 %861, %v602_v29  }
 0x579   : > { %607 = vperm.xlu0 %857, %v601_v30   ;;  %v664_v49 = vpop.permute.xlu1 %663 }
 0x57a   : > { %v674_v1 = vmul.f32 %v808_v6, %v664_v49 }
 0x57d   : > { %862 = vset.pattern.permute.xlu0 %v894_v33 }
 0x5ec   : > { %v577_v50 = vpop.xlane.xlu0 %576 }
 0x5ed   : > { %v581_v51 = vmul.f32 0.03125, %v577_v50 }
 0x5ef   : > { %v583_v52 = vadd.f32 1e-05, %v581_v51 }
 0x5f0   : > { %v580_v53 = vpop.xlane.xlu1 %579 }
 0x5f1   : > { %877 = vrsqrt.f32 %v583_v52  ;;  %v582_v54 = vmul.f32 0.03125, %v580_v53 }
 0x5f3   : > { %v584_v56 = vadd.f32 1e-05, %v582_v54 }
 0x5f4   : > { %v608_v57 = vpop.permute.xlu0 %607  ;;  %v668_v8 = vpop.permute.xlu1 %667 }
 0x5f5   : > { %879 = vrsqrt.f32 %v584_v56  ;;  %v619_v59 = vmul.f32 %v804_v55, %v608_v57  ;;  %v675_v13 = vmul.f32 %v808_v6, %v668_v8 }
 0x5f7   : > { %v625_v63 = vadd.f32 %v805_v60, %v619_v59  ;;  %v677_v20 = vadd.f32 %v675_v13, %v660_v17 }
 0x5f9   : > { %v642_v5 = vadd.f32 %v640_v62, %v625_v63  ;;  %v679_v27 = vmax.f32 %v677_v20, 0.0 }
 0x5fb   : > { %v659_v7 = vadd.f32 %v657_v4, %v642_v5 }
 0x5fd   : > { %v676_v15 = vadd.f32 %v674_v1, %v659_v7 }
 0x5fe   : > { %v878_v12 = vpop.eup %877 }
 0x5ff   : > { %v591_v14 = vmul.f32 %v878_v12, %v802_v9  ;;  %v678_v22 = vmax.f32 %v676_v15, 0.0 }
 0x601   : > { %v593_v18 = vmul.f32 %v591_v14, %v571_v36  ;;  %v810_v36 = vld [vmem:[%s1050_s5 + $0xb] ss:$0 sm:$0xff] }
 0x602   : > { %v880_v19 = vpop.eup %879 }
 0x603   : > { %v599_v21 = vadd.f32 %v803_v16, %v593_v18  ;;  %v592_v23 = vmul.f32 %v880_v19, %v802_v9 }
 0x605   : > { %v680_v24 = vadd.f32 %v678_v22, %v599_v21  ;;  %v594_v25 = vmul.f32 %v592_v23, %v572_v40 }
 0x607   : > { %v682_v28 = vmax.f32 %v680_v24, 0.0  ;;  %v600_v29 = vadd.f32 %v803_v16, %v594_v25 }
 0x609   : > { %v689_v30 = vmul.f32 %v809_v26, %v682_v28  ;;  %v681_v31 = vadd.f32 %v679_v27, %v600_v29 }
 0x60b   : > { %v691_v32 = vsel %vm345_vm2, %v689_v30, 0.0  ;;  %v683_v33 = vmax.f32 %v681_v31, 0.0 }
 0x60c   : > { %692 = vadd.xlane.f32.xlu1 %v691_v32 }
 0x60d   : > { %v690_v34 = vmul.f32 %v809_v26, %v683_v33 }
 0x60f   : > { %v694_v35 = vsel %vm345_vm2, %v690_v34, 0.0 }
 0x610   : > { %695 = vadd.xlane.f32.xlu0 %v694_v35 }
 0x695   : > { %v693_v37 = vpop.xlane.xlu1 %692 }
 0x696   : > { %v702_v38 = vadd.f32 %v810_v36, %v693_v37 }
 0x698   : > { %705 = vst.msk [vmem:[%s275_s9] sm:$0xff] %vm704_vm3, %v702_v38 }
 0x699   : > { %v696_v39 = vpop.xlane.xlu0 %695 }
 0x69a   : > { %v703_v40 = vadd.f32 %v810_v36, %v696_v39 }
 0x69c   : > { %706 = vst.msk [vmem:[%s275_s9 + $0x8] sm:$0xff] %vm704_vm3, %v703_v40 }
 0x69d PF: > { %s16_s21 = sadd.s32 1, %s887_s21  }
 0x69e   : > { %p13_p4 = scmp.ge.s32.totalorder %s16_s21, 4  }
 0x6a0   :  { %15 = sbr.rel (!%p13_p4) target bundleno = 1 (0x1), region = 77 }

</bundles_post_ra>
